<compile_context>
chip_gen: v7x
topology: tpu7x:2x2x1
jax: 0.10.0
libtpu: 0.0.40
codegen_flags: <defaults>
</compile_context>

<pallas_src>
import jax
import jax.numpy as jnp
from jax.experimental import pallas as pl
from jax.experimental.pallas import tpu as pltpu

LANE = 128


def _conv_relu_kernel(x_ref, w_ref, b_ref, o_ref):
    """One (batch, row-tile) step of 3x3 conv + bias + ReLU.

    x_ref: (1, 1, TH+2, W, 3*Cin)  bf16  kw-folded, halo'd input row block
    w_ref: (3, 3*Cin, Cout_pad)    bf16  resident across the whole grid
    b_ref: (1, Cout_pad)           f32
    o_ref: (1, 1, TH*W, Cout_pad)  f32   lane-dense output slab
    """
    th_plus_2, W, K = x_ref.shape[2], x_ref.shape[3], x_ref.shape[4]
    TH = th_plus_2 - 2
    Cpad = o_ref.shape[3]

    x = x_ref[0, 0]                                   # (TH+2, W, 3*Cin) in vregs
    acc = jnp.zeros((TH * W, Cpad), jnp.float32)
    # 3 matmuls with K = 3*Cin (kw and cin folded into the contraction).
    # Slab slice is a leading-dim slice; the reshape only merges leading dims.
    for kh in range(3):
        slab = x[kh:kh + TH].reshape(TH * W, K)
        acc = acc + jnp.dot(slab, w_ref[kh],
                            preferred_element_type=jnp.float32)
    acc = acc + b_ref[...]                            # f32 bias, broadcast over rows
    acc = jnp.maximum(acc, 0.0)                       # ReLU in f32
    o_ref[0, 0] = acc.astype(o_ref.dtype)             # single lane-dense store


def conv_relu_pallas(x_nchw, weight, bias, *, row_tile=8):
    """ConvRelu forward (matches nn.Conv2d(in_, out, 3, padding=1) + ReLU).

    Args:
      x_nchw: (N, Cin, H, W) float32   (PyTorch NCHW convention)
      weight: (Cout, Cin, 3, 3) float32
      bias:   (Cout,) float32
    Returns:
      (N, Cout, H, W) float32
    """
    N, Cin, H, W = x_nchw.shape
    Cout = weight.shape[0]
    Cpad = ((Cout + LANE - 1) // LANE) * LANE
    TH = min(row_tile, H)
    nt = -(-H // TH)              # cdiv
    Hp = nt * TH                  # H padded up to a multiple of the row tile

    # ---- wrapper glue (layout + halo prep), fused by XLA around the call ----
    # TODO(synk): for full elimination of these HBM passes keep the surrounding
    # model NHWC and do the halo/kw-fold via in-kernel DMA; here we keep the
    # PyTorch NCHW interface of the module.
    x_nhwc = jnp.transpose(x_nchw, (0, 2, 3, 1))                       # (N,H,W,Cin)
    xp = jnp.pad(x_nhwc, ((0, 0), (1, 1 + Hp - H), (1, 1), (0, 0)))    # (N,Hp+2,W+2,Cin)
    # Fold the 3 kw taps into the channel (lane) dim:  (N, Hp+2, W, 3*Cin)
    xf = jnp.concatenate([xp[:, :, kw:kw + W, :] for kw in range(3)], axis=-1)
    # Non-overlapping row tiles, each with a 2-row halo: (N, nt, TH+2, W, 3*Cin)
    xt = jnp.stack([xf[:, t * TH:t * TH + TH + 2] for t in range(nt)], axis=1)
    xt = xt.astype(jnp.bfloat16)

    # Weights folded once: (Cout,Cin,3,3) -> (3, 3*Cin, Cout_pad) bf16.
    w = jnp.transpose(weight, (2, 3, 1, 0)).reshape(3, 3 * Cin, Cout)
    w = jnp.pad(w, ((0, 0), (0, 0), (0, Cpad - Cout))).astype(jnp.bfloat16)
    b = jnp.pad(bias, (0, Cpad - Cout)).reshape(1, Cpad).astype(jnp.float32)

    flops = 2 * N * H * W * 9 * Cin * Cout
    bytes_accessed = (xt.size * 2 + w.size * 2 + b.size * 4
                      + N * nt * TH * W * Cpad * 4)

    out_tiles = pl.pallas_call(
        _conv_relu_kernel,
        out_shape=jax.ShapeDtypeStruct((N, nt, TH * W, Cpad), jnp.float32),
        grid_spec=pltpu.PrefetchScalarGridSpec(
            num_scalar_prefetch=0,
            grid=(N, nt),
            in_specs=[
                pl.BlockSpec((1, 1, TH + 2, W, 3 * Cin),
                             lambda n, t: (n, t, 0, 0, 0)),
                pl.BlockSpec((3, 3 * Cin, Cpad), lambda n, t: (0, 0, 0)),
                pl.BlockSpec((1, Cpad), lambda n, t: (0, 0)),
            ],
            out_specs=pl.BlockSpec((1, 1, TH * W, Cpad),
                                   lambda n, t: (n, t, 0, 0)),
        ),
        compiler_params=pltpu.CompilerParams(
            dimension_semantics=("parallel", "parallel"),
            vmem_limit_bytes=32 * 1024 * 1024,   # tiles sized well under 64 MiB (v7x)
        ),
        cost_estimate=pl.CostEstimate(
            flops=flops, transcendentals=0, bytes_accessed=bytes_accessed),
    )(xt, w, b)

    # (N, nt, TH*W, Cpad) -> (N, Hp, W, Cpad) -> drop padded rows / channels.
    out = out_tiles.reshape(N, Hp, W, Cpad)[:, :H, :, :Cout]
    return jnp.transpose(out, (0, 3, 1, 2))                           # (N,Cout,H,W)


def conv_relu_reference(x_nchw, weight, bias):
    """Pure-JAX reference matching nn.Conv2d(3, padding=1) + ReLU."""
    y = jax.lax.conv_general_dilated(
        x_nchw, weight,
        window_strides=(1, 1),
        padding=((1, 1), (1, 1)),
        dimension_numbers=("NCHW", "OIHW", "NCHW"),
    )
    y = y + bias.reshape(1, -1, 1, 1)
    return jnp.maximum(y, 0.0)


if __name__ == "__main__":
    # Small deterministic setup: ConvRelu(in_=4, out=8), input (2, 4, 16, 16).
    N, Cin, Cout, H, W = 2, 4, 8, 16, 16

    key = jax.random.PRNGKey(0)
    kx, kw, kb = jax.random.split(key, 3)

    x = jax.random.normal(kx, (N, Cin, H, W), dtype=jnp.float32)
    # Deterministic parameter init (kaiming-uniform-like scale), not a checkpoint.
    fan_in = Cin * 3 * 3
    bound = 1.0 / (fan_in ** 0.5)
    weight = jax.random.uniform(kw, (Cout, Cin, 3, 3), jnp.float32, -bound, bound)
    bias = jax.random.uniform(kb, (Cout,), jnp.float32, -bound, bound)

    out = conv_relu_pallas(x, weight, bias)
    out = jax.block_until_ready(out)
    assert out.shape == (N, Cout, H, W)

    # Reference with the same bf16 operand quantization (f32 accumulation):
    xq = x.astype(jnp.bfloat16).astype(jnp.float32)
    wq = weight.astype(jnp.bfloat16).astype(jnp.float32)
    ref_q = conv_relu_reference(xq, wq, bias)
    assert jnp.allclose(out, ref_q, atol=1e-4, rtol=1e-4), "mismatch vs bf16-quantized reference"

    # Full-f32 reference (module semantics), loose tol for bf16 operand rounding:
    ref = conv_relu_reference(x, weight, bias)
    assert jnp.allclose(out, ref, atol=5e-2, rtol=5e-2), "mismatch vs f32 reference"

    print("KERNEL_OK")
</pallas_src>

<mosaic_0001>
module attributes {stable_mosaic.version = 11 : i64} {
  func.func @_conv_relu_kernel(%arg0: i32, %arg1: i32, %arg2: memref<1x1x10x16x12xbf16, #tpu.memory_space<vmem>>, %arg3: memref<3x12x128xbf16, #tpu.memory_space<vmem>>, %arg4: memref<1x128xf32, #tpu.memory_space<vmem>>, %arg5: memref<1x1x128x128xf32, #tpu.memory_space<vmem>>) attributes {dimension_semantics = [#tpu.dimension_semantics<parallel>, #tpu.dimension_semantics<parallel>], iteration_bounds = array<i64: 2, 2>, scalar_prefetch = 0 : i64, scratch_operands = 0 : i64, tpu.core_type = #tpu.core_type<tc>, window_params = [{transform_indices = @transform_0, window_bounds = array<i64: 1, 1, 10, 16, 12>}, {pipeline_mode = #tpu.pipeline_mode<synchronous>, transform_indices = @transform_1, window_bounds = array<i64: 3, 12, 128>}, {pipeline_mode = #tpu.pipeline_mode<synchronous>, transform_indices = @transform_2, window_bounds = array<i64: 1, 128>}, {transform_indices = @transform_3, window_bounds = array<i64: 1, 1, 128, 128>}]} {
    %c0 = arith.constant 0 : index
    %c0_0 = arith.constant 0 : index
    %c0_1 = arith.constant 0 : index
    %c0_2 = arith.constant 0 : index
    %c0_3 = arith.constant 0 : index
    %0 = vector.load %arg2[%c0, %c0_0, %c0_1, %c0_2, %c0_3] : memref<1x1x10x16x12xbf16, #tpu.memory_space<vmem>>, vector<1x1x10x16x12xbf16>
    %1 = vector.shape_cast %0 : vector<1x1x10x16x12xbf16> to vector<10x16x12xbf16>
    %cst = arith.constant 0.000000e+00 : f32
    %2 = vector.broadcast %cst : f32 to vector<128x128xf32>
    %3 = vector.extract_strided_slice %1 {offsets = [0, 0, 0], sizes = [8, 16, 12], strides = [1, 1, 1]} : vector<10x16x12xbf16> to vector<8x16x12xbf16>
    %4 = vector.shape_cast %3 : vector<8x16x12xbf16> to vector<128x12xbf16>
    %c0_4 = arith.constant 0 : index
    %c0_5 = arith.constant 0 : index
    %c0_6 = arith.constant 0 : index
    %5 = vector.load %arg3[%c0_4, %c0_5, %c0_6] : memref<3x12x128xbf16, #tpu.memory_space<vmem>>, vector<1x12x128xbf16>
    %6 = vector.shape_cast %5 : vector<1x12x128xbf16> to vector<12x128xbf16>
    %cst_7 = arith.constant dense<0.000000e+00> : vector<128x128xf32>
    %7 = tpu.matmul %4, %6, %cst_7 {dimension_numbers = #tpu.dot_dimension_numbers<[1], [0], [0], [1], [0, 0, 1, 1], [], []>} : vector<128x12xbf16>, vector<12x128xbf16>, vector<128x128xf32> -> vector<128x128xf32>
    %8 = arith.addf %2, %7 : vector<128x128xf32>
    %9 = vector.extract_strided_slice %1 {offsets = [1, 0, 0], sizes = [8, 16, 12], strides = [1, 1, 1]} : vector<10x16x12xbf16> to vector<8x16x12xbf16>
    %10 = vector.shape_cast %9 : vector<8x16x12xbf16> to vector<128x12xbf16>
    %c1 = arith.constant 1 : index
    %c0_8 = arith.constant 0 : index
    %c0_9 = arith.constant 0 : index
    %11 = vector.load %arg3[%c1, %c0_8, %c0_9] : memref<3x12x128xbf16, #tpu.memory_space<vmem>>, vector<1x12x128xbf16>
    %12 = vector.shape_cast %11 : vector<1x12x128xbf16> to vector<12x128xbf16>
    %cst_10 = arith.constant dense<0.000000e+00> : vector<128x128xf32>
    %13 = tpu.matmul %10, %12, %cst_10 {dimension_numbers = #tpu.dot_dimension_numbers<[1], [0], [0], [1], [0, 0, 1, 1], [], []>} : vector<128x12xbf16>, vector<12x128xbf16>, vector<128x128xf32> -> vector<128x128xf32>
    %14 = arith.addf %8, %13 : vector<128x128xf32>
    %15 = vector.extract_strided_slice %1 {offsets = [2, 0, 0], sizes = [8, 16, 12], strides = [1, 1, 1]} : vector<10x16x12xbf16> to vector<8x16x12xbf16>
    %16 = vector.shape_cast %15 : vector<8x16x12xbf16> to vector<128x12xbf16>
    %c2 = arith.constant 2 : index
    %c0_11 = arith.constant 0 : index
    %c0_12 = arith.constant 0 : index
    %17 = vector.load %arg3[%c2, %c0_11, %c0_12] : memref<3x12x128xbf16, #tpu.memory_space<vmem>>, vector<1x12x128xbf16>
    %18 = vector.shape_cast %17 : vector<1x12x128xbf16> to vector<12x128xbf16>
    %cst_13 = arith.constant dense<0.000000e+00> : vector<128x128xf32>
    %19 = tpu.matmul %16, %18, %cst_13 {dimension_numbers = #tpu.dot_dimension_numbers<[1], [0], [0], [1], [0, 0, 1, 1], [], []>} : vector<128x12xbf16>, vector<12x128xbf16>, vector<128x128xf32> -> vector<128x128xf32>
    %20 = arith.addf %14, %19 : vector<128x128xf32>
    %c0_14 = arith.constant 0 : index
    %c0_15 = arith.constant 0 : index
    %21 = vector.load %arg4[%c0_14, %c0_15] : memref<1x128xf32, #tpu.memory_space<vmem>>, vector<1x128xf32>
    %22 = vector.broadcast %21 : vector<1x128xf32> to vector<128x128xf32>
    %23 = arith.addf %20, %22 : vector<128x128xf32>
    %cst_16 = arith.constant 0.000000e+00 : f32
    %24 = vector.broadcast %cst_16 : f32 to vector<128x128xf32>
    %25 = arith.maximumf %23, %24 : vector<128x128xf32>
    %c0_17 = arith.constant 0 : index
    %c0_18 = arith.constant 0 : index
    %c0_19 = arith.constant 0 : index
    %c0_20 = arith.constant 0 : index
    %26 = vector.load %arg5[%c0_17, %c0_18, %c0_19, %c0_20] : memref<1x1x128x128xf32, #tpu.memory_space<vmem>>, vector<1x1x128x128xf32>
    %27 = vector.shape_cast %26 : vector<1x1x128x128xf32> to vector<128x128xf32>
    %28 = vector.shape_cast %25 : vector<128x128xf32> to vector<1x1x128x128xf32>
    tpu.vector_store %arg5[%c0_17, %c0_18, %c0_19, %c0_20], %28 {strides = array<i32>} : memref<1x1x128x128xf32, #tpu.memory_space<vmem>>, vector<1x1x128x128xf32>,
    return
  }
  func.func @transform_0(%arg0: i32, %arg1: i32) -> (i32, i32, i32, i32, i32) {
    %c0_i32 = arith.constant 0 : i32
    %c0_i32_0 = arith.constant 0 : i32
    %c0_i32_1 = arith.constant 0 : i32
    %c0_i32_2 = arith.constant 0 : i32
    return %arg0, %arg1, %c0_i32, %c0_i32_0, %c0_i32_1 : i32, i32, i32, i32, i32
  }
  func.func @transform_1(%arg0: i32, %arg1: i32) -> (i32, i32, i32) {
    %c0_i32 = arith.constant 0 : i32
    %c0_i32_0 = arith.constant 0 : i32
    %c0_i32_1 = arith.constant 0 : i32
    %c0_i32_2 = arith.constant 0 : i32
    return %c0_i32, %c0_i32_0, %c0_i32_1 : i32, i32, i32
  }
  func.func @transform_2(%arg0: i32, %arg1: i32) -> (i32, i32) {
    %c0_i32 = arith.constant 0 : i32
    %c0_i32_0 = arith.constant 0 : i32
    %c0_i32_1 = arith.constant 0 : i32
    return %c0_i32, %c0_i32_0 : i32, i32
  }
  func.func @transform_3(%arg0: i32, %arg1: i32) -> (i32, i32, i32, i32) {
    %c0_i32 = arith.constant 0 : i32
    %c0_i32_0 = arith.constant 0 : i32
    %c0_i32_1 = arith.constant 0 : i32
    return %arg0, %arg1, %c0_i32, %c0_i32_0 : i32, i32, i32, i32
  }
}

</mosaic_0001>

<bundles_post_ra>
// kernel: tpu_custom_call.1
= control target key start
LH: loop header
LB: loop body
LE: loop exit
PB: predicated region body
PF: predicated region fallthrough
CT: control target
= control target key end

     0   :  { %8 = vsyncpa [#allocation3], 0  ;;  %s1412_s0 = inlined_call_operand.vmem [shape: bf16[2,2,10,16,12], index: 0, kind: input, shape index: {}]   ;;  %s1413_s1 = inlined_call_operand.vmem [shape: bf16[3,12,128], index: 1, kind: input, shape index: {}]   ;;  %s1414_s2 = inlined_call_operand.vmem [shape: f32[1,128], index: 2, kind: input, shape index: {}]   ;;  %s1415_s3 = inlined_call_operand.hbm [shape: f32[2,2,128,128], index: 3, kind: output, shape index: {}]  }
   0x1   :  { %10 = vsyncpa [#allocation3 + $0x1], 0  ;;  %s1176_s12 = smov 0   ;;  %s1178_s13 = smov 0  }
   0x2   :  { %s1180_s14 = smov 0   ;;  %s1182_s15 = smov 0  }
   0x3   :  { %s1184_s16 = smov 0   ;;  %s1186_s17 = smov 0  }
   0x4   :  { %s1188_s18 = smov 0   ;;  %s1190_s19 = smov 0  }
   0x5 LB: > { %s795_s20 = sadd.s32 4294967295, %s1151_s19   ;;  %s796_s21 = sadd.s32 4294967294, %s1151_s19   ;;  %s1151_s19 = sphi %s1190_s19, %s16_s19   ;;  %s1147_s18 = sphi %s1188_s18, %s1424_s18   ;;  %s1143_s17 = sphi %s1186_s17, %s1423_s17   ;;  %s1139_s16 = sphi %s1184_s16, %s1422_s16   ;;  %s1135_s15 = sphi %s1182_s15, %s1421_s15   ;;  %s1131_s14 = sphi %s1180_s14, %s1420_s14   ;;  %s1127_s13 = sphi %s1178_s13, %s1419_s13   ;;  %s1123_s12 = sphi %s1176_s12, %s1418_s12  }
   0x6   : > { %s25_s22 = sadd.s32 1, %s1143_s17  ;;  %s28_s23 = sadd.s32 1, %s1147_s18 }
   0x7   : > { %p26_p0 = scmp.ge.s32.totalorder %s25_s22, 2  ;;  %p117_p1 = scmp.ne.s32.totalorder %s1131_s14, %s1127_s13 }
   0x8   : > { %p118_p2 = scmp.eq.s32.totalorder %s795_s20, 3  ;;  %p123_p5 = scmp.ne.s32.totalorder %s1127_s13, %s1123_s12 }
   0x9   : > { %s1426_s22 = smov (%p26_p0, %s25_s22), 0  ;;  %s1428_s23 = smov (!%p26_p0, %s28_s23), %s1147_s18 }
   0xa   : > { %s103_s24 = ssub.s32 %s1143_s17, %s1426_s22  ;;  %p1227_p3 = por %p118_p2, %p117_p1 }
   0xb   : > { %p30_p4 = scmp.ge.s32.totalorder %s1428_s23, 2  ;;  %p124_p6 = scmp.eq.s32.totalorder %s796_s21, 3 }
   0xc   : > { %p799_p7 = scmp.ge.s32.totalorder %s1151_s19, 1  ;;  %p160_p9 = scmp.lt.s32.totalorder %s1151_s19, 5 }
   0xd   : > { %s1430_s23 = smov (%p30_p4, %s1428_s23), 0  ;;  %p1236_p8 = por %p124_p6, %p123_p5 }
   0xe   : > { %s102_s27 = ssub.s32 %s1147_s18, %s1430_s23  ;;  %s107_s28 = sadd.s32 1, %s1131_s14 }
   0xf   : > { %s104_s29 = sor.u32 %s103_s24, %s102_s27  ;;  %p161_p10 = pnand %p799_p7, %p160_p9 }
  0x10   : > { %p105_p11 = scmp.eq.s32.totalorder %s104_s29, 0  ;;  %v1044_v0 = vld [vmem:[%s1413_s1 + $0x8] sm:$0x3f] (!%p161_p10)   ;;  %vm293_vm0 = vcmask (!%p161_p10), 1045504   ;;  %p188_p12 = scmp.lt.s32.totalorder (!%p161_p10), %s1139_s16, 1  ;;  %vm268_vm1 = vcmask (!%p161_p10), 97280  }
  0x11   : > { %164 = sbr.rel (%p161_p10) target bundleno = 310 (0x136), region = 32  ;;  %965 = vmatprep.subr.msk.bf16.mxu1 (!%p161_p10), %vm293_vm0, %v1044_v0  ;;  %v1045_v1 = vld [vmem:[%s1413_s1] sm:$0x3f] (!%p161_p10)   ;;  %v295_v2 = vsel (!%p161_p10), %vm293_vm0, %v1044_v0, 0  ;;  %p190_p13 = scmp.lt.s32.totalorder (!%p161_p10), %s1135_s15, 1 }
  0x12   : > { %s1245_s30 = scalar_select %p105_p11, %s1131_s14, %s107_s28  }
  0x13   : > { %878 = vmatpush3.bf16.msra.mxu1 (!%p161_p10), %v295_v2  ;;  %966 = vmatprep.subr.msk.bf16.mxu0 (!%p161_p10), %vm293_vm0, %v1045_v1  ;;  %v408_v3 = vsel (!%p161_p10), %vm293_vm0, %v1045_v1, 0  ;;  %v1048_v4 = vld [vmem:[%s1413_s1 + $0x10] sm:$0x3f] (!%p161_p10)   ;;  %s185_s5 = sand.u32 (!%p161_p10), 1, %s1127_s13   ;;  %v1310_v25 = vld [vmem:[%s1414_s2] ss:$0 sm:$0xff] (!%p161_p10) }
  0x14   : > { %967 = vmatprep.subr.msk.bf16.mxu1 (!%p161_p10), %vm293_vm0, %v1045_v1  ;;  %896 = vmatpush3.bf16.msra.mxu0 (!%p161_p10), %v408_v3  ;;  %v524_v8 = vsel (!%p161_p10), %vm293_vm0, %v1048_v4, 0  ;;  %s845_s10 = sshll.u32 (!%p161_p10), %s1135_s15, 4  ;;  %s846_s11 = sshll.u32 (!%p161_p10), %s1139_s16, 5 }
  0x15   : > { %968 = vmatprep.subr.msk.bf16.mxu0 (!%p161_p10), %vm293_vm0, %v1048_v4  ;;  %s1360_s28 = scalar_lea.sflag (!%p161_p10), [#allocation3], %s185_s5 }
  0x18   : > { %s189_s8 = scalar_select %p188_p12, %s1139_s16, 1 }
  0x19   : > { %s191_s9 = scalar_select %p190_p13, %s1135_s15, 1 }
  0x1a   : > { %s970_s20 = smul.u32 40, %s189_s8  ;;  %s800_s8 = sshll.u32 %s185_s5, 7 }
  0x1b   : > { %s969_s21 = smul.u32 20, %s191_s9  ;;  %s1318_s9 = scalar_lea.vmem [#allocation2], %s800_s8 }
  0x1c   : > { %s710_s16 = sshll.u32 %s1318_s9, 4  ;;  %s1353_s16 = int_to_ptr.vmem [resolvable:$true] %s710_s16 }
  0x1d   : > { %s194_s24 = sadd.s32 %s970_s20, %s969_s21  ;;  %s707_s20 = sadd.s32 %s846_s11, %s845_s10 }
  0x1e   : > { %s801_s27 = sshll.u32 %s194_s24, 2  ;;  %s847_s15 = sshll.u32 %s707_s20, 7 }
  0x1f   : > { %s1269_s4 = scalar_lea.vmem %s1412_s0, %s801_s27  ;;  %s1351_s27 = scalar_lea.hbm %s1415_s3, %s847_s15 }
  0x20   : > { %v1046_v5 = vld [vmem:[%s1269_s4 + $0x8] sm:$0xff]   ;;  %v1047_v6 = vld [vmem:[%s1269_s4] sm:$0xff]   ;;  %v1049_v7 = vld [vmem:[%s1269_s4 + $0x10] sm:$0xff]   ;;  %s1057_s29 = scalar_lea.vmem %s1353_s16, 2048 }
  0x21   : > { %879 = vmatprep.mubr.msk.bf16.mxu1 %vm268_vm1, %v1046_v5  ;;  %897 = vmatprep.mubr.msk.bf16.mxu0 %vm268_vm1, %v1047_v6  ;;  %v1050_v9 = vld [vmem:[%s1269_s4 + $0x18] sm:$0xff]   ;;  %v1051_v10 = vld [vmem:[%s1269_s4 + $0x20] sm:$0xff]   ;;  %v1052_v11 = vld [vmem:[%s1269_s4 + $0x28] sm:$0xff]   ;;  %p1058_p0 = scmp.ne.s32.totalorder %s1353_s16, %s1057_s29 }
  0x22   : > { %880 = vmatmul.mubr.msk.bf16.vlgmr.msra.gmra.mrb[0].mxu1 %vm268_vm1, %v1049_v7  ;;  %898 = vmatmul.mubr.msk.bf16.vlgmr.msra.gmra.mrb[0].mxu0 %vm268_vm1, %v1046_v5  ;;  %v1053_v12 = vld [vmem:[%s1269_s4 + $0x30] sm:$0xff]   ;;  %v1054_v13 = vld [vmem:[%s1269_s4 + $0x38] sm:$0xff]   ;;  %v1055_v14 = vld [vmem:[%s1269_s4 + $0x40] sm:$0xff]  }
  0x23   : > { %932 = vmatpush3.bf16.msra.mxu1 %v408_v3  ;;  %914 = vmatpush3.bf16.msra.mxu0 %v524_v8  ;;  %v1056_v15 = vld [vmem:[%s1269_s4 + $0x48] sm:$0xff]   ;;  %p1059_p1 = pnand %p1058_p0, %p1227_p3  ;;  %s1153_s4 = smov [#allocation2]  }
  0x24   : > { %883 = vmatprep.mubr.msk.bf16.mxu1 %vm268_vm1, %v1050_v9  ;;  %901 = vmatprep.mubr.msk.bf16.mxu0 %vm268_vm1, %v1049_v7  ;;  %s1061_s6 = sshll.u32 %s1153_s4, 4  ;;  %s1062_s6 = int_to_ptr.vmem [resolvable:$false] %s1061_s6 }
  0x25   : > { %p1060_p2 = pneg %p1059_p1  ;;  %s1063_s7 = scalar_lea.vmem %s1062_s6, 4096 }
  0x26   : > { %p1064_p4 = scmp.lt.s32.totalorder %s1353_s16, %s1062_s6  ;;  %p1065_p5 = scmp.lt.s32.totalorder %s1063_s7, %s1057_s29 }
  0x28   : > { %p1066_p6 = por %p1065_p5, %p1064_p4 }
  0x2a   : > { %884 = vmatmul.mubr.msk.bf16.gmra.mrb[4].mxu1 %vm268_vm1, %v1051_v10  ;;  %902 = vmatmul.mubr.msk.bf16.gmra.mrb[4].mxu0 %vm268_vm1, %v1050_v9  ;;  %p1067_p7 = pnand %p1066_p6, %p1060_p2 }
  0x2b   : > { %887 = vmatprep.mubr.msk.bf16.mxu1 %vm268_vm1, %v1052_v11  ;;  %915 = vmatprep.mubr.msk.bf16.mxu0 %vm268_vm1, %v1049_v7 }
  0x32   : > { %888 = vmatmul.mubr.msk.bf16.gmra.mrb[8].mxu1 %vm268_vm1, %v1053_v12  ;;  %916 = vmatmul.mubr.msk.bf16.vlgmr.msra.gmra.mrb[0].mxu0 %vm268_vm1, %v1050_v9 }
  0x33   : > { %891 = vmatprep.mubr.msk.bf16.mxu1 %vm268_vm1, %v1054_v13  ;;  %919 = vmatprep.mubr.msk.bf16.mxu0 %vm268_vm1, %v1051_v10 }
  0x3a   : > { %892 = vmatmul.mubr.msk.bf16.gmra.mrb[12].mxu1 %vm268_vm1, %v1055_v14  ;;  %920 = vmatmul.mubr.msk.bf16.gmra.mrb[4].mxu0 %vm268_vm1, %v1052_v11 }
  0x3b   : > { %905 = vmatprep.mubr.msk.bf16.mxu1 %vm268_vm1, %v1051_v10  ;;  %923 = vmatprep.mubr.msk.bf16.mxu0 %vm268_vm1, %v1053_v12 }
  0x42   : > { %906 = vmatmul.mubr.msk.bf16.vlgmr.msra.gmra.mrb[8].mxu1 %vm268_vm1, %v1052_v11  ;;  %924 = vmatmul.mubr.msk.bf16.gmra.mrb[8].mxu0 %vm268_vm1, %v1054_v13 }
  0x43   : > { %909 = vmatprep.mubr.msk.bf16.mxu1 %vm268_vm1, %v1053_v12  ;;  %927 = vmatprep.mubr.msk.bf16.mxu0 %vm268_vm1, %v1055_v14 }
  0x4a   : > { %910 = vmatmul.mubr.msk.bf16.gmra.mrb[12].mxu1 %vm268_vm1, %v1054_v13  ;;  %928 = vmatmul.mubr.msk.bf16.gmra.mrb[12].mxu0 %vm268_vm1, %v1056_v15 }
  0xf5   : > { %v881_v16 = vpop.f32.mrb[0].mxu1 }
  0xf6   : > { %v331_v17 = vpop.f32.mrb[1].mxu1 }
  0xf7   : > { %v882_v18 = vpop.f32.mrb[2].mxu1 }
  0xf8   : > { %v334_v19 = vpop.f32.mrb[3].mxu1 }
  0xfd   : > { %v885_v20 = vpop.f32.mrb[4].mxu1 }
  0xfe   : > { %v347_v21 = vpop.f32.mrb[5].mxu1 }
  0xff   : > { %v886_v22 = vpop.f32.mrb[6].mxu1 }
 0x100   : > { %v350_v23 = vpop.f32.mrb[7].mxu1 }
 0x105   : > { %v917_v24 = vpop.f32.mrb[0].mxu0 }
 0x106   : > { %v933_v26 = vadd.f32 %v917_v24, %v881_v16  ;;  %v560_v27 = vpop.f32.mrb[1].mxu0 }
 0x107   : > { %v934_v28 = vadd.f32 %v560_v27, %v331_v17  ;;  %v918_v29 = vpop.f32.mrb[2].mxu0 }
 0x108   : > { %v648_v30 = vadd.f32 %v933_v26, %v1310_v25  ;;  %v935_v31 = vadd.f32 %v918_v29, %v882_v18  ;;  %v563_v32 = vpop.f32.mrb[3].mxu0 }
 0x109   : > { %v646_v33 = vadd.f32 %v934_v28, %v1310_v25  ;;  %v936_v34 = vadd.f32 %v563_v32, %v334_v19 }
 0x10a   : > { %v664_v35 = vmax.f32 %v648_v30, 0.0  ;;  %v649_v36 = vadd.f32 %v935_v31, %v1310_v25 }
 0x10b   : > { %v662_v37 = vmax.f32 %v646_v33, 0.0  ;;  %v647_v38 = vadd.f32 %v936_v34, %v1310_v25 }
 0x10c   : > { %680 = vst [vmem:[%s1318_s9 + $0x10] sm:$0xff] %v664_v35  ;;  %v665_v39 = vmax.f32 %v649_v36, 0.0 }
 0x10d   : > { %678 = vst [vmem:[%s1318_s9] sm:$0xff] %v662_v37  ;;  %v663_v40 = vmax.f32 %v647_v38, 0.0  ;;  %v921_v41 = vpop.f32.mrb[4].mxu0 }
 0x10e   : > { %681 = vst [vmem:[%s1318_s9 + $0x18] sm:$0xff] %v665_v39  ;;  %v937_v42 = vadd.f32 %v921_v41, %v885_v20  ;;  %v576_v43 = vpop.f32.mrb[5].mxu0 }
 0x10f   : > { %679 = vst [vmem:[%s1318_s9 + $0x8] sm:$0xff] %v663_v40  ;;  %v938_v44 = vadd.f32 %v576_v43, %v347_v21  ;;  %v922_v45 = vpop.f32.mrb[6].mxu0 }
 0x110   : > { %v652_v46 = vadd.f32 %v937_v42, %v1310_v25  ;;  %v939_v47 = vadd.f32 %v922_v45, %v886_v22  ;;  %v579_v48 = vpop.f32.mrb[7].mxu0 }
 0x111   : > { %v650_v49 = vadd.f32 %v938_v44, %v1310_v25  ;;  %v940_v50 = vadd.f32 %v579_v48, %v350_v23 }
 0x112   : > { %v668_v51 = vmax.f32 %v652_v46, 0.0  ;;  %v653_v52 = vadd.f32 %v939_v47, %v1310_v25 }
 0x113   : > { %v666_v53 = vmax.f32 %v650_v49, 0.0  ;;  %v651_v54 = vadd.f32 %v940_v50, %v1310_v25 }
 0x114   : > { %684 = vst [vmem:[%s1318_s9 + $0x30] sm:$0xff] %v668_v51  ;;  %v669_v55 = vmax.f32 %v653_v52, 0.0 }
 0x115   : > { %682 = vst [vmem:[%s1318_s9 + $0x20] sm:$0xff] %v666_v53  ;;  %v667_v56 = vmax.f32 %v651_v54, 0.0  ;;  %v907_v57 = vpop.f32.mrb[8].mxu1  ;;  %v925_v58 = vpop.f32.mrb[8].mxu0 }
 0x116   : > { %685 = vst [vmem:[%s1318_s9 + $0x38] sm:$0xff] %v669_v55  ;;  %v941_v59 = vadd.f32 %v925_v58, %v907_v57  ;;  %v476_v60 = vpop.f32.mrb[9].mxu1  ;;  %v592_v61 = vpop.f32.mrb[9].mxu0 }
 0x117   : > { %683 = vst [vmem:[%s1318_s9 + $0x28] sm:$0xff] %v667_v56  ;;  %v942_v62 = vadd.f32 %v592_v61, %v476_v60  ;;  %v908_v63 = vpop.f32.mrb[10].mxu1  ;;  %v926_v0 = vpop.f32.mrb[10].mxu0 }
 0x118   : > { %v656_v1 = vadd.f32 %v941_v59, %v1310_v25  ;;  %v943_v2 = vadd.f32 %v926_v0, %v908_v63  ;;  %v479_v3 = vpop.f32.mrb[11].mxu1  ;;  %v595_v4 = vpop.f32.mrb[11].mxu0 }
 0x119   : > { %v654_v5 = vadd.f32 %v942_v62, %v1310_v25  ;;  %v944_v6 = vadd.f32 %v595_v4, %v479_v3 }
 0x11a   : > { %v672_v7 = vmax.f32 %v656_v1, 0.0  ;;  %v657_v8 = vadd.f32 %v943_v2, %v1310_v25 }
 0x11b   : > { %v670_v9 = vmax.f32 %v654_v5, 0.0  ;;  %v655_v10 = vadd.f32 %v944_v6, %v1310_v25 }
 0x11c   : > { %688 = vst [vmem:[%s1318_s9 + $0x50] sm:$0xff] %v672_v7  ;;  %v673_v11 = vmax.f32 %v657_v8, 0.0 }
 0x11d   : > { %686 = vst [vmem:[%s1318_s9 + $0x40] sm:$0xff] %v670_v9  ;;  %v671_v12 = vmax.f32 %v655_v10, 0.0  ;;  %v911_v13 = vpop.f32.mrb[12].mxu1  ;;  %v929_v14 = vpop.f32.mrb[12].mxu0 }
 0x11e   : > { %689 = vst [vmem:[%s1318_s9 + $0x58] sm:$0xff] %v673_v11  ;;  %v945_v15 = vadd.f32 %v929_v14, %v911_v13  ;;  %v492_v16 = vpop.f32.mrb[13].mxu1  ;;  %v608_v17 = vpop.f32.mrb[13].mxu0 }
 0x11f   : > { %687 = vst [vmem:[%s1318_s9 + $0x48] sm:$0xff] %v671_v12  ;;  %v946_v18 = vadd.f32 %v608_v17, %v492_v16  ;;  %v912_v19 = vpop.f32.mrb[14].mxu1  ;;  %v930_v20 = vpop.f32.mrb[14].mxu0 }
 0x120   : > { %v660_v21 = vadd.f32 %v945_v15, %v1310_v25  ;;  %v947_v22 = vadd.f32 %v930_v20, %v912_v19  ;;  %v495_v23 = vpop.f32.mrb[15].mxu1  ;;  %v611_v24 = vpop.f32.mrb[15].mxu0 }
 0x121   : > { %v658_v26 = vadd.f32 %v946_v18, %v1310_v25  ;;  %v948_v27 = vadd.f32 %v611_v24, %v495_v23 }
 0x122   : > { %v676_v28 = vmax.f32 %v660_v21, 0.0  ;;  %v661_v29 = vadd.f32 %v947_v22, %v1310_v25 }
 0x123   : > { %v674_v30 = vmax.f32 %v658_v26, 0.0  ;;  %v659_v31 = vadd.f32 %v948_v27, %v1310_v25 }
 0x124   : > { %692 = vst [vmem:[%s1318_s9 + $0x70] sm:$0xff] %v676_v28  ;;  %v677_v32 = vmax.f32 %v661_v29, 0.0 }
 0x125   : > { %690 = vst [vmem:[%s1318_s9 + $0x60] sm:$0xff] %v674_v30  ;;  %v675_v33 = vmax.f32 %v659_v31, 0.0 }
 0x126   : > { %693 = vst [vmem:[%s1318_s9 + $0x78] sm:$0xff] %v677_v32 }
 0x127   : > { %691 = vst [vmem:[%s1318_s9 + $0x68] sm:$0xff] %v675_v33 }
 0x128   : > { %1070 = shalt.err (!%p1067_p7)
}
 0x129   : > { %s1071_s5 = scalar_lea.hbm %s1351_s27, 2048  ;;  %s1075_s10 = scalar_lea.hbm %s1415_s3, 8192 }
 0x12a   : > { %p1072_p9 = scmp.ne.s32.totalorder %s1351_s27, %s1071_s5  ;;  %p1076_p12 = scmp.lt.u32.totalorder %s1351_s27, %s1415_s3 }
 0x12b   : > { %p1077_p13 = scmp.lt.u32.totalorder %s1075_s10, %s1071_s5  ;;  %p1079_p1 = scmp.lt.u32.totalorder %s1071_s5, %s1351_s27 }
 0x12c   : > { %p1073_p10 = pnand %p1072_p9, %p1227_p3 }
 0x12d   : > { %p1078_p0 = por %p1077_p13, %p1076_p12 }
 0x12e   : > { %p1074_p11 = pneg %p1073_p10 }
 0x12f   : > { %p1080_p2 = por %p1079_p1, %p1078_p0 }
 0x131   : > { %p1081_p4 = pnand %p1080_p2, %p1074_p11 }
 0x133   : > { %1084 = shalt.err (!%p1081_p4)
}
 0x134   : > { %s1154_s15 = smov 128   ;;  %s1155_s21 = smov 8  }
 0x135   : > { %971 = dma.vmem_to_hbm [thread:$0]  (%p1227_p3), %s1353_s16, 2048, %s1351_s27, %s1360_s28, %s1154_s15, %s1154_s15, %s1155_s21  }
 0x136 PF: > { %p977_p5 = scmp.ge.s32.totalorder %s1151_s19, 2  ;;  %s725_s24 = sand.u32 1, %s1123_s12  }
 0x137   : > { %s726_s29 = scalar_lea.sflag [#allocation3], %s725_s24 }
 0x138   : > { %p974_p6 = pnand %p977_p5, %p1236_p8 }
 0x13a   : > { %1118 = dma.done.wait (!%p974_p6), %s726_s29, 2048  }
 0x13b   : > { %1120 = vsyncadd (!%p974_p6), %s726_s29, 4294965248  ;;  %s16_s19 = sadd.s32 1, %s1151_s19   ;;  %s1418_s12 = smov %s1127_s13 }
 0x13c   : > { %p13_p7 = scmp.ge.s32.totalorder %s16_s19, 6   ;;  %s1419_s13 = smov %s1131_s14 }
 0x13d   : > { %s1420_s14 = smov %s1245_s30  ;;  %s1421_s15 = smov %s1143_s17 }
 0x13e   : > { %s1422_s16 = smov %s1147_s18  ;;  %s1423_s17 = smov %s1426_s22 }
 0x13f   : > { %s1424_s18 = smov %s1430_s23  ;;  %15 = sbr.rel (!%p13_p7) target bundleno = 5 (0x5), region = 69 }
 0x146   :  { %731 = vsyncpa [#allocation3], 1 }
 0x147   :  { %733 = vsyncpa [#allocation3 + $0x1], 1 }

</bundles_post_ra>
